<compile_context>
chip_gen: v7x
topology: tpu7x:2x2x1
jax: 0.10.0
libtpu: 0.0.40
codegen_flags: <defaults>
</compile_context>

<pallas_src>
import jax
import jax.numpy as jnp
from jax import lax
from jax.experimental import pallas as pl
from jax.experimental.pallas import tpu as pltpu

KH = KW = 3  # kernel_size=3, stride=1, padding=1
_MiB = 1024 * 1024


def _sepconv_kernel(x_ref, dwp_ref, pwp_ref, pbf_ref, o_ref):
    # x_ref  : (NB, 1, TH+2, W*Cin)   overlapping row strip (halo rows included)
    # dwp_ref: (KH, KW, W*Cin)        depthwise taps tiled across w into the lane dim
    # pwp_ref: (KW*W*Cin, W*Cout)     stacked shifted block-diagonal pointwise matrix
    # pbf_ref: (1, W*Cout)            fused bias (db @ pw + pb), tiled across w
    # o_ref  : (NB, 1, TH, W*Cout)
    nb = x_ref.shape[0]
    th = o_ref.shape[2]
    wc = x_ref.shape[3]
    wco = o_ref.shape[3]

    # Depthwise 3x3 on the VPU, lane-packed (w, cin).  One partial accumulator per kw
    # column; the per-kw lane shift and the W-border zeros are folded into the
    # block-diagonal pointwise matrix, so no lane rotation happens here.
    acc = [jnp.zeros((nb, th, wc), jnp.float32) for _ in range(KW)]
    for kh in range(KH):
        rows = x_ref[:, 0, kh:kh + th, :].astype(jnp.float32)          # (NB, TH, WC)
        for kw in range(KW):
            acc[kw] = acc[kw] + rows * dwp_ref[kh, kw, :].astype(jnp.float32)

    # Single fused pointwise matmul: M = NB*TH, K = KW*W*Cin, N = W*Cout.
    lhs = jnp.concatenate(acc, axis=-1).reshape(nb * th, KW * wc)
    out = jnp.dot(lhs, pwp_ref[...].astype(jnp.float32),
                  preferred_element_type=jnp.float32)
    out = out + pbf_ref[...].astype(jnp.float32)
    # Output block is lane-dense (W*Cout wide) -> unmasked vst.
    o_ref[...] = out.reshape(nb, 1, th, wco).astype(o_ref.dtype)


def _vmem_limit_bytes():
    """Generation-aware VMEM limit: ~112 MiB on 128 MiB parts, ~48 MiB on 64 MiB v7x."""
    cap = 64 * _MiB  # conservative fallback (v7x per-TC capacity)
    try:
        info = pltpu.get_tpu_info()
        cap = int(getattr(info, "vmem_capacity_bytes", cap))
    except Exception:
        pass
    return max(min(cap - 16 * _MiB, 112 * _MiB), 32 * _MiB)


def _tensorcores_per_chip():
    try:
        kind = str(getattr(jax.devices()[0], "device_kind", "")).lower()
        if "v7" in kind or "7x" in kind:
            return 2
    except Exception:
        pass
    return 1


def _choose_strip_rows(H, NB, WC, WCo, itemsize, budget_bytes):
    """Pick a strip height TH that divides H, prefers multiples of 8 and an
    MXU-friendly TH >= 128 when H allows, and whose per-step footprint
    (double-buffered strips + constants + f32 live values) fits the budget."""
    def footprint(th):
        strip_in = NB * (th + 2) * WC * itemsize
        strip_out = NB * th * WCo * itemsize
        consts = (KH * KW * WC + KW * WC * WCo + WCo) * itemsize     # dwp + pwp + pbf
        live = NB * th * (KW * WC + WCo) * 4                         # f32 acc + matmul out
        return 2 * (strip_in + strip_out) + 2 * consts + live

    divisors = sorted(d for d in range(1, H + 1) if H % d == 0)
    fit8 = [d for d in divisors if d % 8 == 0 and footprint(d) <= budget_bytes]
    big = [d for d in fit8 if d >= 128]
    if big:
        return big[0]       # smallest MXU-friendly strip that fits (keeps grid steps for pipelining)
    if fit8:
        return fit8[-1]     # otherwise the largest 8-multiple that fits
    fit = [d for d in divisors if footprint(d) <= budget_bytes]
    return fit[-1] if fit else 1


def separable_conv2d(x_nchw, dw, db, pw, pb, *, strip_rows=None, fold_batch=None):
    """x_nchw: (N, Cin, H, W).  dw: (KH, KW, Cin), db: (Cin,), pw: (Cin, Cout), pb: (Cout,)."""
    N, Cin, H, W = x_nchw.shape
    Cout = pw.shape[1]
    WC, WCo = W * Cin, W * Cout

    if fold_batch is None:
        # Fold the batch into the block on single-TC v5e/v6e (fewer grid steps, bigger M);
        # keep an (N, S) "parallel" grid on 2-TC v7x so both cores get work.
        fold_batch = _tensorcores_per_chip() == 1
    nb = N if fold_batch else 1

    vmem_limit = _vmem_limit_bytes()
    th = strip_rows if strip_rows is not None else _choose_strip_rows(
        H, nb, WC, WCo, x_nchw.dtype.itemsize, vmem_limit // 2)
    assert H % th == 0, "strip height must divide H"
    S = H // th

    # ---- layout: NCHW -> (N, H, W*Cin), lane-packed (w, cin); overlapping strips. ----
    # (The NCHW<->NHWC transpose each way remains because the module's I/O contract is NCHW.)
    x_p = jnp.transpose(x_nchw, (0, 2, 3, 1)).reshape(N, H, WC)
    x_pad = jnp.pad(x_p, ((0, 0), (1, 1), (0, 0)))                   # 1-row zero halo top/bottom
    strips = jnp.stack(
        [lax.slice_in_dim(x_pad, s * th, s * th + th + 2, axis=1) for s in range(S)],
        axis=1)                                                       # (N, S, TH+2, WC)

    # ---- constants (tiny for small-channel configs; built once per shape) ----
    dwp = jnp.tile(dw, (1, 1, W))                                     # (KH, KW, WC)
    # Stacked shifted block-diagonal pointwise matrix: row block kw, entry
    # [w'*Cin+ci, w*Cout+co] is pw[ci, co] iff w' == w + kw - 1 (W borders -> zeros).
    pwp = jnp.concatenate(
        [jnp.kron(jnp.eye(W, k=1 - kw, dtype=pw.dtype), pw) for kw in range(KW)],
        axis=0)                                                       # (KW*WC, WCo)
    pbf = jnp.tile(db @ pw + pb, W).reshape(1, WCo)                   # (1, WCo)

    if fold_batch:
        grid = (S,)
        x_spec = pl.BlockSpec((N, 1, th + 2, WC), lambda s: (0, s, 0, 0))
        o_spec = pl.BlockSpec((N, 1, th, WCo), lambda s: (0, s, 0, 0))
        w_map3 = lambda s: (0, 0, 0)
        w_map2 = lambda s: (0, 0)
        dims = ("parallel",)
    else:
        grid = (N, S)
        x_spec = pl.BlockSpec((1, 1, th + 2, WC), lambda n, s: (n, s, 0, 0))
        o_spec = pl.BlockSpec((1, 1, th, WCo), lambda n, s: (n, s, 0, 0))
        w_map3 = lambda n, s: (0, 0, 0)
        w_map2 = lambda n, s: (0, 0)
        dims = ("parallel", "parallel")

    out_packed = pl.pallas_call(
        _sepconv_kernel,
        out_shape=jax.ShapeDtypeStruct((N, S, th, WCo), x_nchw.dtype),
        grid_spec=pltpu.PrefetchScalarGridSpec(
            num_scalar_prefetch=0,
            grid=grid,
            in_specs=[
                x_spec,
                # Grid-invariant weights: constant index_map -> DMA'd once.
                pl.BlockSpec((KH, KW, WC), w_map3),
                pl.BlockSpec((KW * WC, WCo), w_map2),
                pl.BlockSpec((1, WCo), w_map2),
            ],
            out_specs=o_spec,
        ),
        compiler_params=pltpu.CompilerParams(
            dimension_semantics=dims,
            vmem_limit_bytes=vmem_limit,
        ),
    )(strips, dwp, pwp, pbf)

    # (N, S, TH, W*Cout) -> (N, H, W, Cout) -> NCHW
    return jnp.transpose(out_packed.reshape(N, H, W, Cout), (0, 3, 1, 2))


def _xavier_uniform(key, shape_pt):
    """Xavier-uniform matching torch semantics for a conv weight (O, I/groups, kH, kW)."""
    out_ch, in_ch, kh, kw = shape_pt
    fan_in = in_ch * kh * kw
    fan_out = out_ch * kh * kw
    bound = (6.0 / (fan_in + fan_out)) ** 0.5
    return jax.random.uniform(key, shape_pt, jnp.float32, -bound, bound)


if __name__ == "__main__":
    key = jax.random.PRNGKey(0)
    k_x, k_dw, k_pw = jax.random.split(key, 3)

    N, Cin, H, W = 2, 4, 16, 16
    Cout = 8

    x = jax.random.normal(k_x, (N, Cin, H, W), jnp.float32)

    # Parameters (deterministic init mirroring the PyTorch module's __init__).
    dw_pt = _xavier_uniform(k_dw, (Cin, 1, KH, KW))        # depthwise.weight
    pw_pt = _xavier_uniform(k_pw, (Cout, Cin, 1, 1))       # pointwise.weight
    db = jnp.full((Cin,), 0.2, jnp.float32)                # depthwise.bias
    pb = jnp.full((Cout,), 0.2, jnp.float32)               # pointwise.bias

    # Re-layout weights for the kernel.
    dw = jnp.transpose(dw_pt[:, 0, :, :], (1, 2, 0))       # (KH, KW, Cin)
    pw = jnp.transpose(pw_pt[:, :, 0, 0], (1, 0))          # (Cin, Cout)

    sep_fn = jax.jit(separable_conv2d)
    out = sep_fn(x, dw, db, pw, pb)
    jax.block_until_ready(out)

    # Reference check against lax conv (same semantics as the PyTorch module).
    ref_dw = lax.conv_general_dilated(
        x, dw_pt, window_strides=(1, 1), padding=((1, 1), (1, 1)),
        dimension_numbers=("NCHW", "OIHW", "NCHW"),
        feature_group_count=Cin) + db.reshape(1, Cin, 1, 1)
    ref = lax.conv_general_dilated(
        ref_dw, pw_pt, window_strides=(1, 1), padding=((0, 0), (0, 0)),
        dimension_numbers=("NCHW", "OIHW", "NCHW")) + pb.reshape(1, Cout, 1, 1)

    assert out.shape == (N, Cout, H, W)
    assert jnp.allclose(out, ref, atol=1e-4, rtol=1e-4), "mismatch vs lax reference"

    print("KERNEL_OK")
</pallas_src>

<mosaic_0001>
module attributes {stable_mosaic.version = 11 : i64} {
  func.func @_sepconv_kernel(%arg0: i32, %arg1: memref<2x1x18x64xf32, #tpu.memory_space<vmem>>, %arg2: memref<3x3x64xf32, #tpu.memory_space<vmem>>, %arg3: memref<192x128xf32, #tpu.memory_space<vmem>>, %arg4: memref<1x128xf32, #tpu.memory_space<vmem>>, %arg5: memref<2x1x16x128xf32, #tpu.memory_space<vmem>>) attributes {dimension_semantics = [#tpu.dimension_semantics<parallel>], iteration_bounds = array<i64: 1>, scalar_prefetch = 0 : i64, scratch_operands = 0 : i64, tpu.core_type = #tpu.core_type<tc>, window_params = [{transform_indices = @transform_0, window_bounds = array<i64: 2, 1, 18, 64>}, {pipeline_mode = #tpu.pipeline_mode<synchronous>, transform_indices = @transform_1, window_bounds = array<i64: 3, 3, 64>}, {pipeline_mode = #tpu.pipeline_mode<synchronous>, transform_indices = @transform_2, window_bounds = array<i64: 192, 128>}, {pipeline_mode = #tpu.pipeline_mode<synchronous>, transform_indices = @transform_3, window_bounds = array<i64: 1, 128>}, {transform_indices = @transform_4, window_bounds = array<i64: 2, 1, 16, 128>}]} {
    %cst = arith.constant 0.000000e+00 : f32
    %0 = vector.broadcast %cst : f32 to vector<2x16x64xf32>
    %cst_0 = arith.constant 0.000000e+00 : f32
    %1 = vector.broadcast %cst_0 : f32 to vector<2x16x64xf32>
    %cst_1 = arith.constant 0.000000e+00 : f32
    %2 = vector.broadcast %cst_1 : f32 to vector<2x16x64xf32>
    %c0 = arith.constant 0 : index
    %c0_2 = arith.constant 0 : index
    %c0_3 = arith.constant 0 : index
    %c0_4 = arith.constant 0 : index
    %3 = vector.load %arg1[%c0, %c0_2, %c0_3, %c0_4] : memref<2x1x18x64xf32, #tpu.memory_space<vmem>>, vector<2x1x16x64xf32>
    %4 = vector.shape_cast %3 : vector<2x1x16x64xf32> to vector<2x16x64xf32>
    %c0_5 = arith.constant 0 : index
    %c0_6 = arith.constant 0 : index
    %c0_7 = arith.constant 0 : index
    %5 = vector.load %arg2[%c0_5, %c0_6, %c0_7] : memref<3x3x64xf32, #tpu.memory_space<vmem>>, vector<1x1x64xf32>
    %6 = vector.shape_cast %5 : vector<1x1x64xf32> to vector<64xf32>
    %7 = vector.shape_cast %6 : vector<64xf32> to vector<1x1x64xf32>
    %8 = vector.broadcast %7 : vector<1x1x64xf32> to vector<2x16x64xf32>
    %9 = arith.mulf %4, %8 : vector<2x16x64xf32>
    %10 = arith.addf %0, %9 : vector<2x16x64xf32>
    %c0_8 = arith.constant 0 : index
    %c1 = arith.constant 1 : index
    %c0_9 = arith.constant 0 : index
    %11 = vector.load %arg2[%c0_8, %c1, %c0_9] : memref<3x3x64xf32, #tpu.memory_space<vmem>>, vector<1x1x64xf32>
    %12 = vector.shape_cast %11 : vector<1x1x64xf32> to vector<64xf32>
    %13 = vector.shape_cast %12 : vector<64xf32> to vector<1x1x64xf32>
    %14 = vector.broadcast %13 : vector<1x1x64xf32> to vector<2x16x64xf32>
    %15 = arith.mulf %4, %14 : vector<2x16x64xf32>
    %16 = arith.addf %1, %15 : vector<2x16x64xf32>
    %c0_10 = arith.constant 0 : index
    %c2 = arith.constant 2 : index
    %c0_11 = arith.constant 0 : index
    %17 = vector.load %arg2[%c0_10, %c2, %c0_11] : memref<3x3x64xf32, #tpu.memory_space<vmem>>, vector<1x1x64xf32>
    %18 = vector.shape_cast %17 : vector<1x1x64xf32> to vector<64xf32>
    %19 = vector.shape_cast %18 : vector<64xf32> to vector<1x1x64xf32>
    %20 = vector.broadcast %19 : vector<1x1x64xf32> to vector<2x16x64xf32>
    %21 = arith.mulf %4, %20 : vector<2x16x64xf32>
    %22 = arith.addf %2, %21 : vector<2x16x64xf32>
    %c0_12 = arith.constant 0 : index
    %c0_13 = arith.constant 0 : index
    %c1_14 = arith.constant 1 : index
    %c0_15 = arith.constant 0 : index
    %23 = vector.load %arg1[%c0_12, %c0_13, %c1_14, %c0_15] : memref<2x1x18x64xf32, #tpu.memory_space<vmem>>, vector<2x1x16x64xf32>
    %24 = vector.shape_cast %23 : vector<2x1x16x64xf32> to vector<2x16x64xf32>
    %c1_16 = arith.constant 1 : index
    %c0_17 = arith.constant 0 : index
    %c0_18 = arith.constant 0 : index
    %25 = vector.load %arg2[%c1_16, %c0_17, %c0_18] : memref<3x3x64xf32, #tpu.memory_space<vmem>>, vector<1x1x64xf32>
    %26 = vector.shape_cast %25 : vector<1x1x64xf32> to vector<64xf32>
    %27 = vector.shape_cast %26 : vector<64xf32> to vector<1x1x64xf32>
    %28 = vector.broadcast %27 : vector<1x1x64xf32> to vector<2x16x64xf32>
    %29 = arith.mulf %24, %28 : vector<2x16x64xf32>
    %30 = arith.addf %10, %29 : vector<2x16x64xf32>
    %c1_19 = arith.constant 1 : index
    %c1_20 = arith.constant 1 : index
    %c0_21 = arith.constant 0 : index
    %31 = vector.load %arg2[%c1_19, %c1_20, %c0_21] : memref<3x3x64xf32, #tpu.memory_space<vmem>>, vector<1x1x64xf32>
    %32 = vector.shape_cast %31 : vector<1x1x64xf32> to vector<64xf32>
    %33 = vector.shape_cast %32 : vector<64xf32> to vector<1x1x64xf32>
    %34 = vector.broadcast %33 : vector<1x1x64xf32> to vector<2x16x64xf32>
    %35 = arith.mulf %24, %34 : vector<2x16x64xf32>
    %36 = arith.addf %16, %35 : vector<2x16x64xf32>
    %c1_22 = arith.constant 1 : index
    %c2_23 = arith.constant 2 : index
    %c0_24 = arith.constant 0 : index
    %37 = vector.load %arg2[%c1_22, %c2_23, %c0_24] : memref<3x3x64xf32, #tpu.memory_space<vmem>>, vector<1x1x64xf32>
    %38 = vector.shape_cast %37 : vector<1x1x64xf32> to vector<64xf32>
    %39 = vector.shape_cast %38 : vector<64xf32> to vector<1x1x64xf32>
    %40 = vector.broadcast %39 : vector<1x1x64xf32> to vector<2x16x64xf32>
    %41 = arith.mulf %24, %40 : vector<2x16x64xf32>
    %42 = arith.addf %22, %41 : vector<2x16x64xf32>
    %c0_25 = arith.constant 0 : index
    %c0_26 = arith.constant 0 : index
    %c2_27 = arith.constant 2 : index
    %c0_28 = arith.constant 0 : index
    %43 = vector.load %arg1[%c0_25, %c0_26, %c2_27, %c0_28] : memref<2x1x18x64xf32, #tpu.memory_space<vmem>>, vector<2x1x16x64xf32>
    %44 = vector.shape_cast %43 : vector<2x1x16x64xf32> to vector<2x16x64xf32>
    %c2_29 = arith.constant 2 : index
    %c0_30 = arith.constant 0 : index
    %c0_31 = arith.constant 0 : index
    %45 = vector.load %arg2[%c2_29, %c0_30, %c0_31] : memref<3x3x64xf32, #tpu.memory_space<vmem>>, vector<1x1x64xf32>
    %46 = vector.shape_cast %45 : vector<1x1x64xf32> to vector<64xf32>
    %47 = vector.shape_cast %46 : vector<64xf32> to vector<1x1x64xf32>
    %48 = vector.broadcast %47 : vector<1x1x64xf32> to vector<2x16x64xf32>
    %49 = arith.mulf %44, %48 : vector<2x16x64xf32>
    %50 = arith.addf %30, %49 : vector<2x16x64xf32>
    %c2_32 = arith.constant 2 : index
    %c1_33 = arith.constant 1 : index
    %c0_34 = arith.constant 0 : index
    %51 = vector.load %arg2[%c2_32, %c1_33, %c0_34] : memref<3x3x64xf32, #tpu.memory_space<vmem>>, vector<1x1x64xf32>
    %52 = vector.shape_cast %51 : vector<1x1x64xf32> to vector<64xf32>
    %53 = vector.shape_cast %52 : vector<64xf32> to vector<1x1x64xf32>
    %54 = vector.broadcast %53 : vector<1x1x64xf32> to vector<2x16x64xf32>
    %55 = arith.mulf %44, %54 : vector<2x16x64xf32>
    %56 = arith.addf %36, %55 : vector<2x16x64xf32>
    %c2_35 = arith.constant 2 : index
    %c2_36 = arith.constant 2 : index
    %c0_37 = arith.constant 0 : index
    %57 = vector.load %arg2[%c2_35, %c2_36, %c0_37] : memref<3x3x64xf32, #tpu.memory_space<vmem>>, vector<1x1x64xf32>
    %58 = vector.shape_cast %57 : vector<1x1x64xf32> to vector<64xf32>
    %59 = vector.shape_cast %58 : vector<64xf32> to vector<1x1x64xf32>
    %60 = vector.broadcast %59 : vector<1x1x64xf32> to vector<2x16x64xf32>
    %61 = arith.mulf %44, %60 : vector<2x16x64xf32>
    %62 = arith.addf %42, %61 : vector<2x16x64xf32>
    %63 = tpu.concatenate %50, %56, %62 in 2 : vector<2x16x64xf32>, vector<2x16x64xf32>, vector<2x16x64xf32> -> vector<2x16x192xf32>
    %64 = vector.shape_cast %63 : vector<2x16x192xf32> to vector<32x192xf32>
    %c0_38 = arith.constant 0 : index
    %c0_39 = arith.constant 0 : index
    %65 = vector.load %arg3[%c0_38, %c0_39] : memref<192x128xf32, #tpu.memory_space<vmem>>, vector<192x128xf32>
    %cst_40 = arith.constant dense<0.000000e+00> : vector<32x128xf32>
    %66 = tpu.matmul %64, %65, %cst_40 {dimension_numbers = #tpu.dot_dimension_numbers<[1], [0], [0], [1], [0, 0, 1, 1], [], []>} : vector<32x192xf32>, vector<192x128xf32>, vector<32x128xf32> -> vector<32x128xf32>
    %c0_41 = arith.constant 0 : index
    %c0_42 = arith.constant 0 : index
    %67 = vector.load %arg4[%c0_41, %c0_42] : memref<1x128xf32, #tpu.memory_space<vmem>>, vector<1x128xf32>
    %68 = vector.broadcast %67 : vector<1x128xf32> to vector<32x128xf32>
    %69 = arith.addf %66, %68 : vector<32x128xf32>
    %70 = vector.shape_cast %69 : vector<32x128xf32> to vector<2x1x16x128xf32>
    %c0_43 = arith.constant 0 : index
    %c0_44 = arith.constant 0 : index
    %c0_45 = arith.constant 0 : index
    %c0_46 = arith.constant 0 : index
    %71 = vector.load %arg5[%c0_43, %c0_44, %c0_45, %c0_46] : memref<2x1x16x128xf32, #tpu.memory_space<vmem>>, vector<2x1x16x128xf32>
    tpu.vector_store %arg5[%c0_43, %c0_44, %c0_45, %c0_46], %70 {strides = array<i32>} : memref<2x1x16x128xf32, #tpu.memory_space<vmem>>, vector<2x1x16x128xf32>,
    return
  }
  func.func @transform_0(%arg0: i32) -> (i32, i32, i32, i32) {
    %c0_i32 = arith.constant 0 : i32
    %c0_i32_0 = arith.constant 0 : i32
    %c0_i32_1 = arith.constant 0 : i32
    %c0_i32_2 = arith.constant 0 : i32
    return %c0_i32, %arg0, %c0_i32_0, %c0_i32_1 : i32, i32, i32, i32
  }
  func.func @transform_1(%arg0: i32) -> (i32, i32, i32) {
    %c0_i32 = arith.constant 0 : i32
    %c0_i32_0 = arith.constant 0 : i32
    %c0_i32_1 = arith.constant 0 : i32
    %c0_i32_2 = arith.constant 0 : i32
    return %c0_i32, %c0_i32_0, %c0_i32_1 : i32, i32, i32
  }
  func.func @transform_2(%arg0: i32) -> (i32, i32) {
    %c0_i32 = arith.constant 0 : i32
    %c0_i32_0 = arith.constant 0 : i32
    %c0_i32_1 = arith.constant 0 : i32
    return %c0_i32, %c0_i32_0 : i32, i32
  }
  func.func @transform_3(%arg0: i32) -> (i32, i32) {
    %c0_i32 = arith.constant 0 : i32
    %c0_i32_0 = arith.constant 0 : i32
    %c0_i32_1 = arith.constant 0 : i32
    return %c0_i32, %c0_i32_0 : i32, i32
  }
  func.func @transform_4(%arg0: i32) -> (i32, i32, i32, i32) {
    %c0_i32 = arith.constant 0 : i32
    %c0_i32_0 = arith.constant 0 : i32
    %c0_i32_1 = arith.constant 0 : i32
    %c0_i32_2 = arith.constant 0 : i32
    return %c0_i32, %arg0, %c0_i32_0, %c0_i32_1 : i32, i32, i32, i32
  }
}

</mosaic_0001>

<bundles_post_ra>
// kernel: tile.14
= control target key start
LH: loop header
LB: loop body
LE: loop exit
PB: predicated region body
PF: predicated region fallthrough
CT: control target
= control target key end

     0   :  { %s633_s10 = smov 56   ;;  %s634_s11 = smov 60   ;;  %vm6_vm0 = vcmask 1043458   ;;  %vm10_vm1 = vcmask 1045508   ;;  %vm14_vm2 = vcmask 1047558   ;;  %vm16_vm3 = vcmask 31744   ;;  %s961_s0 = inlined_call_operand.vmem [shape: f32[3,3,16,4], index: 0, kind: input, shape index: {}]   ;;  %s962_s1 = inlined_call_operand.vmem [shape: f32[3,3,64], index: 1, kind: output, shape index: {}]  }
   0x1   :  { %v550_v0 = vld [vmem:[%s961_s0 + $0x8e] sm:$0x1]   ;;  %v545_v1 = vld [vmem:[%s961_s0 + $0x8f] sm:$0x1]   ;;  %s61_s12 = smov 3  ;;  %s64_s13 = smov 12 }
   0x2   :  { %88 = vrot.lane.b32.xlu1 %v550_v0, %s633_s10  ;;  %55 = vrot.lane.b32.xlu0 %v545_v1, %s634_s11  ;;  %v546_v2 = vld [vmem:[%s961_s0 + $0xe] ss:$16 sm:%s61_s12]   ;;  %s69_s18 = smov 48  ;;  %s74_s19 = smov 192  ;;  %vm47_vm4 = vcmask 523744   ;;  %vm80_vm5 = vcmask 490944  }
   0x3   :  { %v547_v3 = vld [vmem:[%s961_s0 + $0xe] ss:$16 sm:%s64_s13]   ;;  %s28_s24 = smov 3  ;;  %s31_s25 = smov 12  ;;  %v555_v15 = vld [vmem:[%s961_s0 + $0x8d] sm:$0x1]  }
   0x4   :  { %v67_v4 = vsel %vm6_vm0, %v547_v3, %v546_v2  ;;  %v548_v5 = vld [vmem:[%s961_s0 + $0xe] ss:$16 sm:%s69_s18]   ;;  %v541_v8 = vld [vmem:[%s961_s0 + $0xf] ss:$16 sm:%s28_s24]   ;;  %s36_s30 = smov 48  ;;  %s41_s2 = smov 192 }
   0x5   :  { %v549_v6 = vld [vmem:[%s961_s0 + $0xe] ss:$16 sm:%s74_s19]   ;;  %v72_v7 = vsel %vm10_vm1, %v548_v5, %v67_v4  ;;  %v542_v9 = vld [vmem:[%s961_s0 + $0xf] ss:$16 sm:%s31_s25]   ;;  %s94_s7 = smov 3  ;;  %s97_s13 = smov 12 }
   0x6   :  { %v77_v10 = vsel %vm14_vm2, %v549_v6, %v72_v7  ;;  %v34_v11 = vsel %vm6_vm0, %v542_v9, %v541_v8  ;;  %v543_v12 = vld [vmem:[%s961_s0 + $0xf] ss:$16 sm:%s36_s30]   ;;  %v551_v16 = vld [vmem:[%s961_s0 + $0xd] ss:$16 sm:%s94_s7]   ;;  %s102_s14 = smov 48  ;;  %s107_s19 = smov 192 }
   0x7   :  { %v544_v13 = vld [vmem:[%s961_s0 + $0xf] ss:$16 sm:%s41_s2]   ;;  %78 = vrot.lane.b32.xlu1 %v77_v10, %s633_s10  ;;  %v39_v14 = vsel %vm10_vm1, %v543_v12, %v34_v11  ;;  %s127_s21 = smov 3  ;;  %s130_s22 = smov 12  ;;  %v560_v26 = vld [vmem:[%s961_s0 + $0x8c] sm:$0x1]  }
   0x8   :  { %v44_v17 = vsel %vm14_vm2, %v544_v13, %v39_v14  ;;  %v552_v18 = vld [vmem:[%s961_s0 + $0xd] ss:$16 sm:%s97_s13]   ;;  %v556_v23 = vld [vmem:[%s961_s0 + $0xc] ss:$16 sm:%s127_s21]   ;;  %s135_s27 = smov 48  ;;  %s140_s28 = smov 192 }
   0x9   :  { %v553_v19 = vld [vmem:[%s961_s0 + $0xd] ss:$16 sm:%s102_s14]   ;;  %45 = vrot.lane.b32.xlu0 %v44_v17, %s634_s11  ;;  %v100_v20 = vsel %vm6_vm0, %v552_v18, %v551_v16  ;;  %s635_s29 = smov 52   ;;  %s160_s5 = smov 3  ;;  %v565_v37 = vld [vmem:[%s961_s0 + $0x8b] sm:$0x1]  }
   0xa   :  { %v554_v21 = vld [vmem:[%s961_s0 + $0xd] ss:$16 sm:%s107_s19]   ;;  %v105_v22 = vsel %vm10_vm1, %v553_v19, %v100_v20  ;;  %v557_v24 = vld [vmem:[%s961_s0 + $0xc] ss:$16 sm:%s130_s22]   ;;  %s163_s10 = smov 12  ;;  %s168_s12 = smov 48 }
   0xb   :  { %121 = vrot.lane.b32.xlu1 %v555_v15, %s635_s29  ;;  %v110_v25 = vsel %vm14_vm2, %v554_v21, %v105_v22  ;;  %v133_v27 = vsel %vm6_vm0, %v557_v24, %v556_v23  ;;  %v558_v28 = vld [vmem:[%s961_s0 + $0xc] ss:$16 sm:%s135_s27]   ;;  %s173_s15 = smov 192  ;;  %s193_s11 = smov 3  ;;  %v570_v46 = vld [vmem:[%s961_s0 + $0x8a] sm:$0x1]  }
   0xc   :  { %v138_v29 = vsel %vm10_vm1, %v558_v28, %v133_v27  ;;  %v559_v30 = vld [vmem:[%s961_s0 + $0xc] ss:$16 sm:%s140_s28]   ;;  %v561_v31 = vld [vmem:[%s961_s0 + $0xb] ss:$16 sm:%s160_s5]   ;;  %s196_s20 = smov 12  ;;  %s636_s21 = smov 48  }
   0xd   :  { %111 = vrot.lane.b32.xlu0 %v110_v25, %s635_s29  ;;  %v562_v32 = vld [vmem:[%s961_s0 + $0xb] ss:$16 sm:%s163_s10]   ;;  %v143_v33 = vsel %vm14_vm2, %v559_v30, %v138_v29  ;;  %s201_s26 = smov 48  ;;  %s206_s2 = smov 192  ;;  %v575_v54 = vld [vmem:[%s961_s0 + $0x89] sm:$0x1]  }
   0xe   :  { %v166_v34 = vsel %vm6_vm0, %v562_v32, %v561_v31  ;;  %v563_v35 = vld [vmem:[%s961_s0 + $0xb] ss:$16 sm:%s168_s12]   ;;  %v566_v39 = vld [vmem:[%s961_s0 + $0xa] ss:$16 sm:%s193_s11]   ;;  %s226_s3 = smov 3  ;;  %s229_s4 = smov 12 }
   0xf   :  { %v564_v36 = vld [vmem:[%s961_s0 + $0xb] ss:$16 sm:%s173_s15]   ;;  %154 = vrot.lane.b32.xlu1 %v560_v26, %s636_s21  ;;  %v171_v38 = vsel %vm10_vm1, %v563_v35, %v166_v34  ;;  %s234_s5 = smov 48  ;;  %s637_s10 = smov 44   ;;  %v580_v62 = vld [vmem:[%s961_s0 + $0x88] sm:$0x1]  }
  0x10   :  { %v567_v40 = vld [vmem:[%s961_s0 + $0xa] ss:$16 sm:%s196_s20]   ;;  %v176_v43 = vsel %vm14_vm2, %v564_v36, %v171_v38  ;;  %v571_v44 = vld [vmem:[%s961_s0 + $0x9] ss:$16 sm:%s226_s3]   ;;  %s259_s16 = smov 3  ;;  %s262_s17 = smov 12 }
  0x11   :  { %v568_v41 = vld [vmem:[%s961_s0 + $0xa] ss:$16 sm:%s201_s26]   ;;  %144 = vrot.lane.b32.xlu0 %v143_v33, %s636_s21  ;;  %v199_v42 = vsel %vm6_vm0, %v567_v40, %v566_v39  ;;  %s239_s11 = smov 192  ;;  %s267_s24 = smov 48  ;;  %v585_v6 = vld [vmem:[%s961_s0 + $0x87] sm:$0x1]  }
  0x12   :  { %v572_v45 = vld [vmem:[%s961_s0 + $0x9] ss:$16 sm:%s229_s4]   ;;  %v204_v47 = vsel %vm10_vm1, %v568_v41, %v199_v42  ;;  %v569_v48 = vld [vmem:[%s961_s0 + $0xa] ss:$16 sm:%s206_s2]   ;;  %s292_s25 = smov 3  ;;  %s295_s26 = smov 12 }
  0x13   :  { %187 = vrot.lane.b32.xlu1 %v565_v37, %s637_s10  ;;  %v232_v49 = vsel %vm6_vm0, %v572_v45, %v571_v44  ;;  %v573_v50 = vld [vmem:[%s961_s0 + $0x9] ss:$16 sm:%s234_s5]   ;;  %v209_v53 = vsel %vm14_vm2, %v569_v48, %v204_v47  ;;  %s638_s27 = smov 40   ;;  %s272_s5 = smov 192  ;;  %v590_v14 = vld [vmem:[%s961_s0 + $0x86] sm:$0x1]  }
  0x14   :  { %v576_v51 = vld [vmem:[%s961_s0 + $0x8] ss:$16 sm:%s259_s16]   ;;  %v237_v55 = vsel %vm10_vm1, %v573_v50, %v232_v49  ;;  %v574_v56 = vld [vmem:[%s961_s0 + $0x9] ss:$16 sm:%s239_s11]   ;;  %s325_s12 = smov 3  ;;  %s328_s13 = smov 12 }
  0x15   :  { %177 = vrot.lane.b32.xlu0 %v176_v43, %s637_s10  ;;  %v577_v52 = vld [vmem:[%s961_s0 + $0x8] ss:$16 sm:%s262_s17]   ;;  %s300_s10 = smov 48  ;;  %v242_v61 = vsel %vm14_vm2, %v574_v56, %v237_v55  ;;  %s639_s14 = smov 36   ;;  %v540_v17 = vld [vmem:[%s961_s0 + $0x80] sm:$0x1]  }
  0x16   :  { %v265_v57 = vsel %vm6_vm0, %v577_v52, %v576_v51  ;;  %v578_v58 = vld [vmem:[%s961_s0 + $0x8] ss:$16 sm:%s267_s24]   ;;  %v581_v59 = vld [vmem:[%s961_s0 + $0x7] ss:$16 sm:%s292_s25]   ;;  %s305_s20 = smov 192  ;;  %s333_s25 = smov 48 }
  0x17   :  { %220 = vrot.lane.b32.xlu1 %v570_v46, %s638_s27  ;;  %v582_v60 = vld [vmem:[%s961_s0 + $0x7] ss:$16 sm:%s295_s26]   ;;  %v270_v63 = vsel %vm10_vm1, %v578_v58, %v265_v57  ;;  %s358_s26 = smov 3  ;;  %s640_s28 = smov 32   ;;  %26 = vst.msk [vmem:[#allocation0 + $0x12] sm:$0x1] %vm16_vm3, %v540_v17  }
  0x18   :  { %v579_v0 = vld [vmem:[%s961_s0 + $0x8] ss:$16 sm:%s272_s5]   ;;  %v298_v1 = vsel %vm6_vm0, %v582_v60, %v581_v59  ;;  %v583_v2 = vld [vmem:[%s961_s0 + $0x7] ss:$16 sm:%s300_s10]   ;;  %s338_s6 = smov 192  ;;  %s394_s16 = smov 12 }
  0x19   :  { %210 = vrot.lane.b32.xlu0 %v209_v53, %s638_s27  ;;  %v586_v3 = vld [vmem:[%s961_s0 + $0x6] ss:$16 sm:%s325_s12]   ;;  %v275_v5 = vsel %vm14_vm2, %v579_v0, %v270_v63  ;;  %s361_s27 = smov 12  ;;  %v303_v7 = vsel %vm10_vm1, %v583_v2, %v298_v1  ;;  %s366_s12 = smov 48  ;;  %v595_v23 = vld [vmem:[%s961_s0 + $0x85] sm:$0x1]  }
  0x1a   :  { %v587_v4 = vld [vmem:[%s961_s0 + $0x6] ss:$16 sm:%s328_s13]   ;;  %v584_v8 = vld [vmem:[%s961_s0 + $0x7] ss:$16 sm:%s305_s20]   ;;  %s391_s13 = smov 3  ;;  %s641_s17 = smov 28  }
  0x1b   :  { %253 = vrot.lane.b32.xlu1 %v575_v54, %s639_s14  ;;  %v331_v9 = vsel %vm6_vm0, %v587_v4, %v586_v3  ;;  %v588_v10 = vld [vmem:[%s961_s0 + $0x6] ss:$16 sm:%s333_s25]   ;;  %v308_v13 = vsel %vm14_vm2, %v584_v8, %v303_v7  ;;  %s371_s23 = smov 192  ;;  %s424_s29 = smov 3  ;;  %v600_v34 = vld [vmem:[%s961_s0 + $0x84] sm:$0x1]  }
  0x1c   :  { %v591_v11 = vld [vmem:[%s961_s0 + $0x5] ss:$16 sm:%s358_s26]   ;;  %v336_v15 = vsel %vm10_vm1, %v588_v10, %v331_v9  ;;  %v589_v16 = vld [vmem:[%s961_s0 + $0x6] ss:$16 sm:%s338_s6]   ;;  %s404_s30 = smov 192  ;;  %s427_s2 = smov 12 }
  0x1d   :  { %243 = vrot.lane.b32.xlu0 %v242_v61, %s639_s14  ;;  %v592_v12 = vld [vmem:[%s961_s0 + $0x5] ss:$16 sm:%s361_s27]   ;;  %v341_v22 = vsel %vm14_vm2, %v589_v16, %v336_v15  ;;  %s642_s3 = smov 24   ;;  %s432_s8 = smov 48  ;;  %v605_v45 = vld [vmem:[%s961_s0 + $0x83] sm:$0x1]  }
  0x1e   :  { %v364_v18 = vsel %vm6_vm0, %v592_v12, %v591_v11  ;;  %v593_v19 = vld [vmem:[%s961_s0 + $0x5] ss:$16 sm:%s366_s12]   ;;  %v596_v20 = vld [vmem:[%s961_s0 + $0x4] ss:$16 sm:%s391_s13]   ;;  %s8_s9 = smov 48  ;;  %s457_s15 = smov 3 }
  0x1f   :  { %286 = vrot.lane.b32.xlu1 %v580_v62, %s640_s28  ;;  %v597_v21 = vld [vmem:[%s961_s0 + $0x4] ss:$16 sm:%s394_s16]   ;;  %v369_v24 = vsel %vm10_vm1, %v593_v19, %v364_v18  ;;  %s2_s16 = smov 3  ;;  %s12_s20 = smov 192  ;;  %v610_v56 = vld [vmem:[%s961_s0 + $0x82] sm:$0x1]  }
  0x20   :  { %v594_v25 = vld [vmem:[%s961_s0 + $0x5] ss:$16 sm:%s371_s23]   ;;  %v397_v26 = vsel %vm6_vm0, %v597_v21, %v596_v20  ;;  %v601_v28 = vld [vmem:[%s961_s0 + $0x3] ss:$16 sm:%s424_s29]   ;;  %s4_s21 = smov 12  ;;  %s460_s24 = smov 12 }
  0x21   :  { %276 = vrot.lane.b32.xlu0 %v275_v5, %s640_s28  ;;  %s399_s28 = smov 48  ;;  %v599_v29 = vld [vmem:[%s961_s0 + $0x4] ss:$16 sm:%s404_s30]   ;;  %v374_v31 = vsel %vm14_vm2, %v594_v25, %v369_v24  ;;  %s643_s27 = smov 20   ;;  %v615_v62 = vld [vmem:[%s961_s0 + $0x81] sm:$0x1]  }
  0x22   :  { %v598_v27 = vld [vmem:[%s961_s0 + $0x4] ss:$16 sm:%s399_s28]   ;;  %v602_v30 = vld [vmem:[%s961_s0 + $0x3] ss:$16 sm:%s427_s2]   ;;  %s437_s5 = smov 192  ;;  %s465_s13 = smov 48 }
  0x23   :  { %319 = vrot.lane.b32.xlu1 %v585_v6, %s641_s17  ;;  %v603_v32 = vld [vmem:[%s961_s0 + $0x3] ss:$16 sm:%s432_s8]   ;;  %v402_v35 = vsel %vm10_vm1, %v598_v27, %v397_v26  ;;  %v430_v38 = vsel %vm6_vm0, %v602_v30, %v601_v28  ;;  %s490_s14 = smov 3  ;;  %s470_s22 = smov 192  ;;  %vm113_vm6 = vcmask 458144   ;;  %vm146_vm7 = vcmask 425344  }
  0x24   :  { %v9_v33 = vld [vmem:[%s961_s0] ss:$16 sm:%s8_s9]   ;;  %v606_v36 = vld [vmem:[%s961_s0 + $0x2] ss:$16 sm:%s457_s15]   ;;  %v407_v43 = vsel %vm14_vm2, %v599_v29, %v402_v35  ;;  %s493_s15 = smov 12  ;;  %v435_v46 = vsel %vm10_vm1, %v603_v32, %v430_v38  ;;  %s645_s28 = smov 12  }
  0x25   :  { %309 = vrot.lane.b32.xlu0 %v308_v13, %s641_s17  ;;  %v3_v37 = vld [vmem:[%s961_s0] ss:$16 sm:%s2_s16]   ;;  %s644_s16 = smov 16   ;;  %s503_s6 = smov 192  ;;  %vm179_vm8 = vcmask 392544   ;;  %vm212_vm9 = vcmask 359744  }
  0x26   :  { %v13_v39 = vld [vmem:[%s961_s0] ss:$16 sm:%s12_s20]   ;;  %v607_v41 = vld [vmem:[%s961_s0 + $0x2] ss:$16 sm:%s460_s24]   ;;  %s646_s7 = smov 8   ;;  %vm245_vm10 = vcmask 326944  }
  0x27   :  { %352 = vrot.lane.b32.xlu1 %v590_v14, %s642_s3  ;;  %v5_v40 = vld [vmem:[%s961_s0] ss:$16 sm:%s4_s21]   ;;  %v463_v49 = vsel %vm6_vm0, %v607_v41, %v606_v36  ;;  %vm278_vm11 = vcmask 294144   ;;  %vm311_vm12 = vcmask 261344   ;;  %vm344_vm13 = vcmask 228544  }
  0x28   :  { %v7_v42 = vsel %vm6_vm0, %v5_v40, %v3_v37  ;;  %v604_v47 = vld [vmem:[%s961_s0 + $0x3] ss:$16 sm:%s437_s5]   ;;  %v608_v50 = vld [vmem:[%s961_s0 + $0x2] ss:$16 sm:%s465_s13]   ;;  %vm377_vm14 = vcmask 195744   ;;  %vm410_vm15 = vcmask 162944  }
  0x29   :  { %342 = vrot.lane.b32.xlu0 %v341_v22, %s642_s3  ;;  %v11_v44 = vsel %vm10_vm1, %v9_v33, %v7_v42  ;;  %v611_v51 = vld [vmem:[%s961_s0 + $0x1] ss:$16 sm:%s490_s14]   ;;  %v440_v53 = vsel %vm14_vm2, %v604_v47, %v435_v46  ;;  %v468_v54 = vsel %vm10_vm1, %v608_v50, %v463_v49 }
  0x2a   :  { %v15_v48 = vsel %vm14_vm2, %v13_v39, %v11_v44  ;;  %v612_v52 = vld [vmem:[%s961_s0 + $0x1] ss:$16 sm:%s493_s15]   ;;  %v609_v55 = vld [vmem:[%s961_s0 + $0x2] ss:$16 sm:%s470_s22]  }
  0x2b   :  { %385 = vrot.lane.b32.xlu1 %v595_v23, %s643_s27  ;;  %17 = vst.msk [vmem:[#allocation0] sm:$0x7] %vm16_vm3, %v15_v48   ;;  %19 = vst.msk [vmem:[#allocation0 + $0x5] sm:$0x38] %vm16_vm3, %v15_v48   ;;  %v496_v57 = vsel %vm6_vm0, %v612_v52, %v611_v51  ;;  %v473_v59 = vsel %vm14_vm2, %v609_v55, %v468_v54  ;;  %v614_v61 = vld [vmem:[%s961_s0 + $0x1] ss:$16 sm:%s503_s6]  }
  0x2c   :  { %21 = vst.msk [vmem:[#allocation0 + $0xa] sm:$0xc0] %vm16_vm3, %v15_v48   ;;  %vm443_vm0 = vcmask 130144  }
  0x2d   :  { %375 = vrot.lane.b32.xlu0 %v374_v31, %s643_s27  ;;  %s498_s27 = smov 48 }
  0x2e   :  { %v613_v58 = vld [vmem:[%s961_s0 + $0x1] ss:$16 sm:%s498_s27]   ;;  %s647_s0 = smov 4  }
  0x2f   :  { %418 = vrot.lane.b32.xlu1 %v600_v34, %s644_s16  ;;  %v501_v60 = vsel %vm10_vm1, %v613_v58, %v496_v57  ;;  %vm476_vm1 = vcmask 97344  }
  0x30   :  { %v506_v63 = vsel %vm14_vm2, %v614_v61, %v501_v60  ;;  %vm509_vm2 = vcmask 64544  }
  0x31   :  { %408 = vrot.lane.b32.xlu0 %v407_v43, %s644_s16 }
  0x33   :  { %451 = vrot.lane.b32.xlu1 %v605_v45, %s645_s28 }
  0x35   :  { %441 = vrot.lane.b32.xlu0 %v440_v53, %s645_s28 }
  0x37   :  { %484 = vrot.lane.b32.xlu1 %v610_v56, %s646_s7 }
  0x39   :  { %474 = vrot.lane.b32.xlu0 %v473_v59, %s646_s7 }
  0x3b   :  { %517 = vrot.lane.b32.xlu1 %v615_v62, %s647_s0 }
  0x3d   :  { %507 = vrot.lane.b32.xlu0 %v506_v63, %s647_s0 }
  0x74   :  { %v89_v0 = vpop.permute.xlu1 %88   ;;  %v56_v1 = vpop.permute.xlu0 %55  }
  0x75   :  { %59 = vst.msk [vmem:[#allocation0 + $0x12] sm:$0x1] %vm47_vm4, %v56_v1  }
  0x76   :  { %92 = vst.msk [vmem:[#allocation0 + $0x12] sm:$0x1] %vm80_vm5, %v89_v0  }
  0x79   :  { %v79_v2 = vpop.permute.xlu1 %78  }
  0x7b   :  { %v46_v3 = vpop.permute.xlu0 %45  }
  0x7c   :  { %48 = vst.msk [vmem:[#allocation0] sm:$0x7] %vm47_vm4, %v46_v3   ;;  %50 = vst.msk [vmem:[#allocation0 + $0x5] sm:$0x38] %vm47_vm4, %v46_v3  }
  0x7d   :  { %52 = vst.msk [vmem:[#allocation0 + $0xa] sm:$0xc0] %vm47_vm4, %v46_v3   ;;  %v122_v4 = vpop.permute.xlu1 %121  }
  0x7e   :  { %81 = vst.msk [vmem:[#allocation0] sm:$0x7] %vm80_vm5, %v79_v2   ;;  %83 = vst.msk [vmem:[#allocation0 + $0x5] sm:$0x38] %vm80_vm5, %v79_v2  }
  0x7f   :  { %85 = vst.msk [vmem:[#allocation0 + $0xa] sm:$0xc0] %vm80_vm5, %v79_v2   ;;  %v112_v5 = vpop.permute.xlu0 %111  }
  0x80   :  { %125 = vst.msk [vmem:[#allocation0 + $0x12] sm:$0x1] %vm113_vm6, %v122_v4   ;;  %114 = vst.msk [vmem:[#allocation0] sm:$0x7] %vm113_vm6, %v112_v5  }
  0x81   :  { %116 = vst.msk [vmem:[#allocation0 + $0x5] sm:$0x38] %vm113_vm6, %v112_v5   ;;  %118 = vst.msk [vmem:[#allocation0 + $0xa] sm:$0xc0] %vm113_vm6, %v112_v5   ;;  %v155_v6 = vpop.permute.xlu1 %154  }
  0x82   :  { %158 = vst.msk [vmem:[#allocation0 + $0x12] sm:$0x1] %vm146_vm7, %v155_v6  }
  0x83   :  { %v145_v7 = vpop.permute.xlu0 %144  }
  0x84   :  { %147 = vst.msk [vmem:[#allocation0] sm:$0x7] %vm146_vm7, %v145_v7   ;;  %149 = vst.msk [vmem:[#allocation0 + $0x5] sm:$0x38] %vm146_vm7, %v145_v7  }
  0x85   :  { %151 = vst.msk [vmem:[#allocation0 + $0xa] sm:$0xc0] %vm146_vm7, %v145_v7   ;;  %v188_v8 = vpop.permute.xlu1 %187  }
  0x86   :  { %191 = vst.msk [vmem:[#allocation0 + $0x12] sm:$0x1] %vm179_vm8, %v188_v8  }
  0x87   :  { %v178_v9 = vpop.permute.xlu0 %177  }
  0x88   :  { %180 = vst.msk [vmem:[#allocation0] sm:$0x7] %vm179_vm8, %v178_v9   ;;  %182 = vst.msk [vmem:[#allocation0 + $0x5] sm:$0x38] %vm179_vm8, %v178_v9  }
  0x89   :  { %184 = vst.msk [vmem:[#allocation0 + $0xa] sm:$0xc0] %vm179_vm8, %v178_v9   ;;  %v221_v10 = vpop.permute.xlu1 %220  }
  0x8a   :  { %224 = vst.msk [vmem:[#allocation0 + $0x12] sm:$0x1] %vm212_vm9, %v221_v10  }
  0x8b   :  { %v211_v11 = vpop.permute.xlu0 %210  }
  0x8c   :  { %213 = vst.msk [vmem:[#allocation0] sm:$0x7] %vm212_vm9, %v211_v11   ;;  %215 = vst.msk [vmem:[#allocation0 + $0x5] sm:$0x38] %vm212_vm9, %v211_v11  }
  0x8d   :  { %217 = vst.msk [vmem:[#allocation0 + $0xa] sm:$0xc0] %vm212_vm9, %v211_v11   ;;  %v254_v12 = vpop.permute.xlu1 %253  }
  0x8e   :  { %257 = vst.msk [vmem:[#allocation0 + $0x12] sm:$0x1] %vm245_vm10, %v254_v12  }
  0x8f   :  { %v244_v13 = vpop.permute.xlu0 %243  }
  0x90   :  { %246 = vst.msk [vmem:[#allocation0] sm:$0x7] %vm245_vm10, %v244_v13   ;;  %248 = vst.msk [vmem:[#allocation0 + $0x5] sm:$0x38] %vm245_vm10, %v244_v13  }
  0x91   :  { %250 = vst.msk [vmem:[#allocation0 + $0xa] sm:$0xc0] %vm245_vm10, %v244_v13   ;;  %v287_v14 = vpop.permute.xlu1 %286  }
  0x92   :  { %290 = vst.msk [vmem:[#allocation0 + $0x12] sm:$0x1] %vm278_vm11, %v287_v14  }
  0x93   :  { %v277_v15 = vpop.permute.xlu0 %276  }
  0x94   :  { %279 = vst.msk [vmem:[#allocation0] sm:$0x7] %vm278_vm11, %v277_v15   ;;  %281 = vst.msk [vmem:[#allocation0 + $0x5] sm:$0x38] %vm278_vm11, %v277_v15  }
  0x95   :  { %283 = vst.msk [vmem:[#allocation0 + $0xa] sm:$0xc0] %vm278_vm11, %v277_v15   ;;  %v320_v16 = vpop.permute.xlu1 %319  }
  0x96   :  { %323 = vst.msk [vmem:[#allocation0 + $0x12] sm:$0x1] %vm311_vm12, %v320_v16  }
  0x97   :  { %v310_v17 = vpop.permute.xlu0 %309  }
  0x98   :  { %312 = vst.msk [vmem:[#allocation0] sm:$0x7] %vm311_vm12, %v310_v17   ;;  %314 = vst.msk [vmem:[#allocation0 + $0x5] sm:$0x38] %vm311_vm12, %v310_v17  }
  0x99   :  { %316 = vst.msk [vmem:[#allocation0 + $0xa] sm:$0xc0] %vm311_vm12, %v310_v17   ;;  %v353_v18 = vpop.permute.xlu1 %352  }
  0x9a   :  { %356 = vst.msk [vmem:[#allocation0 + $0x12] sm:$0x1] %vm344_vm13, %v353_v18  }
  0x9b   :  { %v343_v19 = vpop.permute.xlu0 %342  }
  0x9c   :  { %345 = vst.msk [vmem:[#allocation0] sm:$0x7] %vm344_vm13, %v343_v19   ;;  %347 = vst.msk [vmem:[#allocation0 + $0x5] sm:$0x38] %vm344_vm13, %v343_v19  }
  0x9d   :  { %349 = vst.msk [vmem:[#allocation0 + $0xa] sm:$0xc0] %vm344_vm13, %v343_v19   ;;  %v386_v20 = vpop.permute.xlu1 %385  }
  0x9e   :  { %389 = vst.msk [vmem:[#allocation0 + $0x12] sm:$0x1] %vm377_vm14, %v386_v20  }
  0x9f   :  { %v376_v21 = vpop.permute.xlu0 %375  }
  0xa0   :  { %378 = vst.msk [vmem:[#allocation0] sm:$0x7] %vm377_vm14, %v376_v21   ;;  %380 = vst.msk [vmem:[#allocation0 + $0x5] sm:$0x38] %vm377_vm14, %v376_v21  }
  0xa1   :  { %382 = vst.msk [vmem:[#allocation0 + $0xa] sm:$0xc0] %vm377_vm14, %v376_v21   ;;  %v419_v22 = vpop.permute.xlu1 %418  }
  0xa2   :  { %422 = vst.msk [vmem:[#allocation0 + $0x12] sm:$0x1] %vm410_vm15, %v419_v22  }
  0xa3   :  { %v409_v23 = vpop.permute.xlu0 %408  }
  0xa4   :  { %411 = vst.msk [vmem:[#allocation0] sm:$0x7] %vm410_vm15, %v409_v23   ;;  %413 = vst.msk [vmem:[#allocation0 + $0x5] sm:$0x38] %vm410_vm15, %v409_v23  }
  0xa5   :  { %415 = vst.msk [vmem:[#allocation0 + $0xa] sm:$0xc0] %vm410_vm15, %v409_v23   ;;  %v452_v24 = vpop.permute.xlu1 %451  }
  0xa6   :  { %455 = vst.msk [vmem:[#allocation0 + $0x12] sm:$0x1] %vm443_vm0, %v452_v24  }
  0xa7   :  { %v442_v25 = vpop.permute.xlu0 %441  }
  0xa8   :  { %444 = vst.msk [vmem:[#allocation0] sm:$0x7] %vm443_vm0, %v442_v25   ;;  %446 = vst.msk [vmem:[#allocation0 + $0x5] sm:$0x38] %vm443_vm0, %v442_v25  }
  0xa9   :  { %448 = vst.msk [vmem:[#allocation0 + $0xa] sm:$0xc0] %vm443_vm0, %v442_v25   ;;  %v485_v26 = vpop.permute.xlu1 %484  }
  0xaa   :  { %488 = vst.msk [vmem:[#allocation0 + $0x12] sm:$0x1] %vm476_vm1, %v485_v26  }
  0xab   :  { %v475_v27 = vpop.permute.xlu0 %474  }
  0xac   :  { %477 = vst.msk [vmem:[#allocation0] sm:$0x7] %vm476_vm1, %v475_v27   ;;  %479 = vst.msk [vmem:[#allocation0 + $0x5] sm:$0x38] %vm476_vm1, %v475_v27  }
  0xad   :  { %481 = vst.msk [vmem:[#allocation0 + $0xa] sm:$0xc0] %vm476_vm1, %v475_v27   ;;  %v518_v28 = vpop.permute.xlu1 %517  }
  0xae   :  { %521 = vst.msk [vmem:[#allocation0 + $0x12] sm:$0x1] %vm509_vm2, %v518_v28  }
  0xaf   :  { %v508_v29 = vpop.permute.xlu0 %507  }
  0xb0   :  { %510 = vst.msk [vmem:[#allocation0] sm:$0x7] %vm509_vm2, %v508_v29   ;;  %512 = vst.msk [vmem:[#allocation0 + $0x5] sm:$0x38] %vm509_vm2, %v508_v29  }
  0xb1   :  { %514 = vst.msk [vmem:[#allocation0 + $0xa] sm:$0xc0] %vm509_vm2, %v508_v29  }
  0xb7   :  { %v525_v30 = vld [vmem:[#allocation0] sm:$0xf]  ;;  %v529_v31 = vld [vmem:[#allocation0 + $0x8] sm:$0xf] }
  0xb8   :  { %v534_v32 = vld [vmem:[#allocation0 + $0x10] sm:$0xf]  ;;  %527 = vst [vmem:[%s962_s1] sm:$0xf] %v525_v30  ;;  %616 = vst [vmem:[%s962_s1 + $0x4] sm:$0xf] %v529_v31 }
  0xb9   :  { %617 = vst [vmem:[%s962_s1 + $0x8] sm:$0xf] %v534_v32 }

// kernel: tile.18
= control target key start
LH: loop header
LB: loop body
LE: loop exit
PB: predicated region body
PF: predicated region fallthrough
CT: control target
= control target key end

     0   :  { %s28_s0 = inlined_call_operand.vmem [shape: f32[8], index: 0, kind: input, shape index: {}]   ;;  %s29_s1 = inlined_call_operand.vmem [shape: f32[16,8], index: 1, kind: output, shape index: {}]  }
   0x1   :  { %v4_v0 = vld [vmem:[%s28_s0] ss:$0 sm:$0xff] }
   0x2   :  { %5 = vst [vmem:[%s29_s1] sm:$0xff] %v4_v0  ;;  %8 = vst [vmem:[%s29_s1 + $0x8] sm:$0xff] %v4_v0 }

// kernel: tile.19
= control target key start
LH: loop header
LB: loop body
LE: loop exit
PB: predicated region body
PF: predicated region fallthrough
CT: control target
= control target key end

     0   :  { %s131_s10 = smov 120   ;;  %s132_s11 = smov 104   ;;  %vm3_vm0 = vcmask 64512   ;;  %vm9_vm1 = vcmask 1048512   ;;  %vm15_vm2 = vcmask 982912   ;;  %vm21_vm3 = vcmask 917312   ;;  %s207_s0 = inlined_call_operand.vmem [shape: f32[16,8], index: 0, kind: input, shape index: {}]   ;;  %s208_s1 = inlined_call_operand.vmem [shape: f32[1,128], index: 1, kind: output, shape index: {}]  }
   0x1   :  { %v101_v0 = vld [vmem:[%s207_s0 + $0xf] sm:$0x1]   ;;  %v103_v1 = vld [vmem:[%s207_s0 + $0xd] sm:$0x1]   ;;  %v102_v2 = vld [vmem:[%s207_s0 + $0xe] sm:$0x1]  }
   0x2   :  { %7 = vrot.lane.b32.xlu0 %v101_v0, %s131_s10  ;;  %19 = vrot.lane.b32.xlu1 %v103_v1, %s132_s11  ;;  %v104_v3 = vld [vmem:[%s207_s0 + $0xc] sm:$0x1]   ;;  %s133_s16 = smov 112   ;;  %s134_s17 = smov 96   ;;  %v105_v4 = vld [vmem:[%s207_s0 + $0xb] sm:$0x1]  }
   0x3   :  { %v106_v5 = vld [vmem:[%s207_s0 + $0xa] sm:$0x1]   ;;  %v2_v6 = vld [vmem:[%s207_s0] sm:$0x1]   ;;  %s135_s24 = smov 88   ;;  %s136_s25 = smov 80  }
   0x4   :  { %4 = vst.msk [vmem:[#allocation0] sm:$0x1] %vm3_vm0, %v2_v6   ;;  %v107_v7 = vld [vmem:[%s207_s0 + $0x9] sm:$0x1]   ;;  %v108_v8 = vld [vmem:[%s207_s0 + $0x8] sm:$0x1]  }
   0x5   :  { %s137_s30 = smov 72   ;;  %s138_s2 = smov 64   ;;  %v109_v9 = vld [vmem:[%s207_s0 + $0x7] sm:$0x1]   ;;  %v110_v10 = vld [vmem:[%s207_s0 + $0x6] sm:$0x1]  }
   0x6   :  { %13 = vrot.lane.b32.xlu0 %v102_v2, %s133_s16  ;;  %25 = vrot.lane.b32.xlu1 %v104_v3, %s134_s17  ;;  %s139_s7 = smov 56   ;;  %s140_s8 = smov 48   ;;  %v111_v11 = vld [vmem:[%s207_s0 + $0x5] sm:$0x1]   ;;  %v112_v12 = vld [vmem:[%s207_s0 + $0x4] sm:$0x1]  }
   0x7   :  { %s141_s13 = smov 40   ;;  %s142_s14 = smov 32   ;;  %v113_v13 = vld [vmem:[%s207_s0 + $0x3] sm:$0x1]   ;;  %v114_v14 = vld [vmem:[%s207_s0 + $0x2] sm:$0x1]  }
   0x8   :  { %s143_s19 = smov 24   ;;  %s144_s20 = smov 16   ;;  %v115_v15 = vld [vmem:[%s207_s0 + $0x1] sm:$0x1]   ;;  %vm27_vm4 = vcmask 851712   ;;  %vm33_vm5 = vcmask 786112  }
   0x9   :  { %s145_s0 = smov 8   ;;  %vm39_vm6 = vcmask 720512   ;;  %vm45_vm7 = vcmask 654912   ;;  %vm51_vm8 = vcmask 589312   ;;  %vm57_vm9 = vcmask 523712  }
   0xa   :  { %31 = vrot.lane.b32.xlu0 %v105_v4, %s135_s24  ;;  %37 = vrot.lane.b32.xlu1 %v106_v5, %s136_s25  ;;  %vm63_vm10 = vcmask 458112   ;;  %vm69_vm11 = vcmask 392512   ;;  %vm75_vm12 = vcmask 326912   ;;  %vm81_vm13 = vcmask 261312  }
   0xb   :  { %vm87_vm14 = vcmask 195712   ;;  %vm93_vm15 = vcmask 130112  }
   0xe   :  { %43 = vrot.lane.b32.xlu0 %v107_v7, %s137_s30  ;;  %49 = vrot.lane.b32.xlu1 %v108_v8, %s138_s2 }
  0x12   :  { %55 = vrot.lane.b32.xlu0 %v109_v9, %s139_s7  ;;  %61 = vrot.lane.b32.xlu1 %v110_v10, %s140_s8 }
  0x16   :  { %67 = vrot.lane.b32.xlu0 %v111_v11, %s141_s13  ;;  %73 = vrot.lane.b32.xlu1 %v112_v12, %s142_s14 }
  0x1a   :  { %79 = vrot.lane.b32.xlu0 %v113_v13, %s143_s19  ;;  %85 = vrot.lane.b32.xlu1 %v114_v14, %s144_s20 }
  0x1e   :  { %91 = vrot.lane.b32.xlu0 %v115_v15, %s145_s0 }
  0x74   :  { %v8_v16 = vpop.permute.xlu0 %7   ;;  %v20_v17 = vpop.permute.xlu1 %19  }
  0x75   :  { %10 = vst.msk [vmem:[#allocation0] sm:$0x1] %vm9_vm1, %v8_v16  }
  0x78   :  { %v14_v18 = vpop.permute.xlu0 %13   ;;  %v26_v19 = vpop.permute.xlu1 %25  }
  0x79   :  { %16 = vst.msk [vmem:[#allocation0] sm:$0x1] %vm15_vm2, %v14_v18  }
  0x7a   :  { %22 = vst.msk [vmem:[#allocation0] sm:$0x1] %vm21_vm3, %v20_v17  }
  0x7b   :  { %28 = vst.msk [vmem:[#allocation0] sm:$0x1] %vm27_vm4, %v26_v19  }
  0x7c   :  { %v32_v20 = vpop.permute.xlu0 %31   ;;  %v38_v21 = vpop.permute.xlu1 %37  }
  0x7d   :  { %34 = vst.msk [vmem:[#allocation0] sm:$0x1] %vm33_vm5, %v32_v20  }
  0x7e   :  { %40 = vst.msk [vmem:[#allocation0] sm:$0x1] %vm39_vm6, %v38_v21  }
  0x80   :  { %v44_v22 = vpop.permute.xlu0 %43   ;;  %v50_v23 = vpop.permute.xlu1 %49  }
  0x81   :  { %46 = vst.msk [vmem:[#allocation0] sm:$0x1] %vm45_vm7, %v44_v22  }
  0x82   :  { %52 = vst.msk [vmem:[#allocation0] sm:$0x1] %vm51_vm8, %v50_v23  }
  0x84   :  { %v56_v24 = vpop.permute.xlu0 %55   ;;  %v62_v25 = vpop.permute.xlu1 %61  }
  0x85   :  { %58 = vst.msk [vmem:[#allocation0] sm:$0x1] %vm57_vm9, %v56_v24  }
  0x86   :  { %64 = vst.msk [vmem:[#allocation0] sm:$0x1] %vm63_vm10, %v62_v25  }
  0x88   :  { %v68_v26 = vpop.permute.xlu0 %67   ;;  %v74_v27 = vpop.permute.xlu1 %73  }
  0x89   :  { %70 = vst.msk [vmem:[#allocation0] sm:$0x1] %vm69_vm11, %v68_v26  }
  0x8a   :  { %76 = vst.msk [vmem:[#allocation0] sm:$0x1] %vm75_vm12, %v74_v27  }
  0x8c   :  { %v80_v28 = vpop.permute.xlu0 %79   ;;  %v86_v29 = vpop.permute.xlu1 %85  }
  0x8d   :  { %82 = vst.msk [vmem:[#allocation0] sm:$0x1] %vm81_vm13, %v80_v28  }
  0x8e   :  { %88 = vst.msk [vmem:[#allocation0] sm:$0x1] %vm87_vm14, %v86_v29  }
  0x90   :  { %v92_v30 = vpop.permute.xlu0 %91  }
  0x91   :  { %94 = vst.msk [vmem:[#allocation0] sm:$0x1] %vm93_vm15, %v92_v30  }
  0x98   :  { %v98_v31 = vld [vmem:[#allocation0] sm:$0x1] }
  0x99   :  { %100 = vst [vmem:[%s208_s1] sm:$0x1] %v98_v31 }

// kernel: separable_conv2d.1
= control target key start
LH: loop header
LB: loop body
LE: loop exit
PB: predicated region body
PF: predicated region fallthrough
CT: control target
= control target key end

     0   :  { %v397_v3 = vmov 0.0|0.0   ;;  %s398_s6 = smov 64   ;;  %vm164_vm0 = vcmask 523264   ;;  %s675_s0 = inlined_call_operand.vmem [shape: f32[2,1,18,64], index: 0, kind: input, shape index: {}]   ;;  %s676_s1 = inlined_call_operand.vmem [shape: f32[3,3,64], index: 1, kind: input, shape index: {}]   ;;  %s677_s2 = inlined_call_operand.vmem [shape: f32[192,128], index: 2, kind: input, shape index: {}]   ;;  %s678_s3 = inlined_call_operand.vmem [shape: f32[1,128], index: 3, kind: input, shape index: {}]   ;;  %s679_s4 = inlined_call_operand.vmem [shape: f32[2,1,16,128], index: 4, kind: output, shape index: {}]  }
   0x1   :  { %v427_v0 = vld [vmem:[%s675_s0] sm:$0xff]  ;;  %v432_v1 = vld [vmem:[%s675_s0 + $0x18] sm:$0xff]  ;;  %325 = vmatprep.subr.bf16.mxu0 %v397_v3  ;;  %361 = vmatprep.subr.bf16.mxu1 %v397_v3  ;;  %v317_v13 = vld [vmem:[%s676_s1 + $0x9] ss:$0 sm:$0xff] }
   0x2   :  { %v306_v2 = vld [vmem:[%s676_s1 + $0x1] ss:$0 sm:$0xff]  ;;  %v449_v7 = vld [vmem:[%s675_s0 + $0x19] sm:$0xff]  ;;  %v311_v8 = vld [vmem:[%s676_s1 + $0x5] ss:$0 sm:$0xff] }
   0x3   :  { %v39_v4 = vmul.f32 %v306_v2, %v427_v0  ;;  %v41_v5 = vmul.f32 %v306_v2, %v432_v1  ;;  %v444_v6 = vld [vmem:[%s675_s0 + $0x1] sm:$0xff]  ;;  %v85_v10 = vmul.f32 %v311_v8, %v449_v7  ;;  %v484_v18 = vld [vmem:[%s675_s0 + $0x9] sm:$0xff]  ;;  %v172_v36 = vld [vmem:[%s677_s2 + $0x18] sm:$0xff] }
   0x4   :  { %v83_v9 = vmul.f32 %v311_v8, %v444_v6  ;;  %v459_v11 = vld [vmem:[%s675_s0 + $0x2] sm:$0xff]  ;;  %v464_v12 = vld [vmem:[%s675_s0 + $0x1a] sm:$0xff]  ;;  %v496_v24 = vld [vmem:[%s675_s0 + $0xa] sm:$0xff]  ;;  %v84_v26 = vmul.f32 %v311_v8, %v484_v18 }
   0x5   :  { %v127_v14 = vmul.f32 %v317_v13, %v459_v11  ;;  %v129_v15 = vmul.f32 %v317_v13, %v464_v12  ;;  %v474_v16 = vld [vmem:[%s675_s0 + $0x8] sm:$0xff]  ;;  %v479_v17 = vld [vmem:[%s675_s0 + $0x20] sm:$0xff]  ;;  %v89_v20 = vadd.f32 %v85_v10, %v41_v5  ;;  %v128_v28 = vmul.f32 %v317_v13, %v496_v24  ;;  %v171_v32 = vld [vmem:[%s677_s2 + $0x10] sm:$0xff] }
   0x6   :  { %v87_v19 = vadd.f32 %v83_v9, %v39_v4  ;;  %v40_v21 = vmul.f32 %v306_v2, %v474_v16  ;;  %v42_v22 = vmul.f32 %v306_v2, %v479_v17  ;;  %v491_v23 = vld [vmem:[%s675_s0 + $0x21] sm:$0xff]  ;;  %v329_v40 = vpack.c.bf16 %v172_v36, %v171_v32  ;;  %v175_v45 = vld [vmem:[%s677_s2 + $0x30] sm:$0xff]  ;;  %v176_v46 = vld [vmem:[%s677_s2 + $0x38] sm:$0xff] }
   0x7   :  { %v501_v25 = vld [vmem:[%s675_s0 + $0x22] sm:$0xff]  ;;  %v86_v27 = vmul.f32 %v311_v8, %v491_v23  ;;  %v133_v34 = vadd.f32 %v129_v15, %v89_v20  ;;  %v335_v51 = vpack.c.bf16 %v176_v46, %v175_v45  ;;  %v319_v55 = vld [vmem:[%s676_s1 + $0xa] ss:$0 sm:$0xff]  ;;  %v305_v60 = vld [vmem:[%s676_s1] ss:$0 sm:$0xff] }
   0x8   :  { %v130_v29 = vmul.f32 %v317_v13, %v501_v25  ;;  %v169_v30 = vld [vmem:[%s677_s2] sm:$0xff]  ;;  %v170_v31 = vld [vmem:[%s677_s2 + $0x8] sm:$0xff]  ;;  %v131_v33 = vadd.f32 %v127_v14, %v87_v19  ;;  %v88_v37 = vadd.f32 %v84_v26, %v40_v21  ;;  %v140_v58 = vmul.f32 %v319_v55, %v459_v11 }
   0x9   :  { %v326_v35 = vpack.c.bf16 %v170_v31, %v169_v30  ;;  %v90_v38 = vadd.f32 %v86_v27, %v42_v22  ;;  %v173_v43 = vld [vmem:[%s677_s2 + $0x20] sm:$0xff]  ;;  %v174_v44 = vld [vmem:[%s677_s2 + $0x28] sm:$0xff]  ;;  %v142_v2 = vmul.f32 %v319_v55, %v464_v12  ;;  %v26_v4 = vmul.f32 %v305_v60, %v427_v0 }
   0xa   :  { %v387_v39 = vpack.i.bf16 %v133_v34, %v131_v33  ;;  %v132_v41 = vadd.f32 %v128_v28, %v88_v37  ;;  %v177_v47 = vld [vmem:[%s677_s2 + $0x40] sm:$0xff]  ;;  %v178_v48 = vld [vmem:[%s677_s2 + $0x48] sm:$0xff]  ;;  %v332_v50 = vpack.c.bf16 %v174_v44, %v173_v43  ;;  %v28_v10 = vmul.f32 %v305_v60, %v432_v1  ;;  %v180_v28 = vld [vmem:[%s677_s2 + $0x58] sm:$0xff] }
   0xb   :  { %327 = vmatpush1.bf16.msra.mxu0 %v326_v35  ;;  %373 = vmatpush1.bf16.msra.mxu1 %v326_v35  ;;  %v134_v42 = vadd.f32 %v130_v29, %v90_v38  ;;  %v338_v52 = vpack.c.bf16 %v178_v48, %v177_v47  ;;  %v307_v53 = vld [vmem:[%s676_s1 + $0x2] ss:$0 sm:$0xff]  ;;  %v313_v54 = vld [vmem:[%s676_s1 + $0x6] ss:$0 sm:$0xff]  ;;  %v309_v61 = vld [vmem:[%s676_s1 + $0x4] ss:$0 sm:$0xff]  ;;  %v141_v22 = vmul.f32 %v319_v55, %v496_v24 }
   0xc   :  { %328 = vmatprep.subr.bf16.mxu0 %v397_v3  ;;  %362 = vmatprep.subr.bf16.mxu1 %v397_v3  ;;  %v52_v56 = vmul.f32 %v307_v53, %v427_v0  ;;  %v96_v57 = vmul.f32 %v313_v54, %v444_v6  ;;  %v54_v59 = vmul.f32 %v307_v53, %v432_v1  ;;  %v315_v62 = vld [vmem:[%s676_s1 + $0x8] ss:$0 sm:$0xff]  ;;  %v184_v43 = vld [vmem:[%s677_s2 + $0x78] sm:$0xff]  ;;  %v185_v45 = vld [vmem:[%s677_s2 + $0x80] sm:$0xff] }
   0xd   :  { %388 = vrot.lane.b32.xlu0 %v387_v39, %s398_s6  ;;  %v392_v49 = vpack.i.bf16 %v134_v42, %v132_v41  ;;  %v98_v63 = vmul.f32 %v313_v54, %v449_v7  ;;  %v70_v5 = vmul.f32 %v309_v61, %v444_v6  ;;  %v114_v9 = vmul.f32 %v315_v62, %v459_v11  ;;  %v183_v42 = vld [vmem:[%s677_s2 + $0x70] sm:$0xff]  ;;  %v186_v46 = vld [vmem:[%s677_s2 + $0x88] sm:$0xff] }
   0xe   :  { %v100_v8 = vadd.f32 %v96_v57, %v52_v56  ;;  %v72_v15 = vmul.f32 %v309_v61, %v449_v7  ;;  %v116_v0 = vmul.f32 %v315_v62, %v464_v12  ;;  %v53_v6 = vmul.f32 %v307_v53, %v474_v16  ;;  %v179_v12 = vld [vmem:[%s677_s2 + $0x50] sm:$0xff] }
   0xf   :  { %330 = vmatpush1.bf16.msra.mxu0 %v329_v40  ;;  %374 = vmatpush1.bf16.msra.mxu1 %v329_v40  ;;  %v102_v13 = vadd.f32 %v98_v63, %v54_v59  ;;  %v74_v14 = vadd.f32 %v70_v5, %v26_v4  ;;  %v97_v20 = vmul.f32 %v313_v54, %v484_v18  ;;  %v187_v48 = vld [vmem:[%s677_s2 + $0x90] sm:$0xff]  ;;  %v320_v5 = vld [vmem:[%s678_s3] ss:$0 sm:$0xff] }
  0x10   :  { %331 = vmatprep.subr.bf16.mxu0 %v397_v3  ;;  %363 = vmatprep.subr.bf16.mxu1 %v397_v3  ;;  %v144_v19 = vadd.f32 %v140_v58, %v100_v8  ;;  %v76_v1 = vadd.f32 %v72_v15, %v28_v10  ;;  %v55_v27 = vmul.f32 %v307_v53, %v479_v17 }
  0x11   :  { %393 = vrot.lane.b32.xlu0 %v392_v49, %s398_s6  ;;  %v146_v21 = vadd.f32 %v142_v2, %v102_v13  ;;  %v575_v11 = vadd.f32 %v114_v9, %v74_v14  ;;  %v101_v26 = vadd.f32 %v97_v20, %v53_v6  ;;  %v99_v7 = vmul.f32 %v313_v54, %v491_v23  ;;  %v188_v49 = vld [vmem:[%s677_s2 + $0x98] sm:$0xff]  ;;  %v191_v54 = vld [vmem:[%s677_s2 + $0xb0] sm:$0xff] }
  0x12   :  { %v588_v29 = vadd.f32 %v116_v0, %v76_v1  ;;  %v143_v30 = vmul.f32 %v319_v55, %v501_v25  ;;  %v27_v31 = vmul.f32 %v305_v60, %v474_v16  ;;  %321 = vmatprep.mubr.msk.f32.mxu0 %vm164_vm0, %v144_v19  ;;  %v71_v34 = vmul.f32 %v309_v61, %v484_v18  ;;  %v181_v18 = vld [vmem:[%s677_s2 + $0x60] sm:$0xff]  ;;  %v192_v55 = vld [vmem:[%s677_s2 + $0xb8] sm:$0xff] }
  0x13   :  { %333 = vmatpush1.bf16.msra.mxu0 %v332_v50  ;;  %375 = vmatpush1.bf16.msra.mxu1 %v332_v50  ;;  %v594_v32 = vadd.f32 %v141_v22, %v101_v26  ;;  %v103_v33 = vadd.f32 %v99_v7, %v55_v27  ;;  %v115_v35 = vmul.f32 %v315_v62, %v496_v24 }
  0x14   :  { %334 = vmatprep.subr.bf16.mxu0 %v397_v3  ;;  %364 = vmatprep.subr.bf16.mxu1 %v397_v3  ;;  %v29_v36 = vmul.f32 %v305_v60, %v479_v17  ;;  %v73_v37 = vmul.f32 %v309_v61, %v491_v23  ;;  %v117_v38 = vmul.f32 %v315_v62, %v501_v25  ;;  %v182_v17 = vld [vmem:[%s677_s2 + $0x68] sm:$0xff] }
  0x15   :  { %323 = vmatprep.mubr.msk.f32.mxu1 %vm164_vm0, %v146_v21  ;;  %v341_v16 = vpack.c.bf16 %v180_v28, %v179_v12  ;;  %v147_v39 = vadd.f32 %v143_v30, %v103_v33  ;;  %v75_v40 = vadd.f32 %v71_v34, %v27_v31  ;;  %v344_v41 = vpack.c.bf16 %v182_v17, %v181_v18 }
  0x16   :  { %v77_v23 = vadd.f32 %v73_v37, %v29_v36  ;;  %v347_v44 = vpack.c.bf16 %v184_v43, %v183_v42  ;;  %v350_v47 = vpack.c.bf16 %v186_v46, %v185_v45  ;;  %v353_v50 = vpack.c.bf16 %v188_v49, %v187_v48 }
  0x17   :  { %336 = vmatpush1.bf16.msra.mxu0 %v335_v51  ;;  %376 = vmatpush1.bf16.msra.mxu1 %v335_v51  ;;  %v119_v24 = vadd.f32 %v115_v35, %v75_v40  ;;  %v189_v51 = vld [vmem:[%s677_s2 + $0xa0] sm:$0xff]  ;;  %v359_v56 = vpack.c.bf16 %v192_v55, %v191_v54 }
  0x18   :  { %337 = vmatprep.subr.bf16.mxu0 %v397_v3  ;;  %365 = vmatprep.subr.bf16.mxu1 %v397_v3  ;;  %v121_v25 = vadd.f32 %v117_v38, %v77_v23 }
  0x1b   :  { %339 = vmatpush1.bf16.msra.mxu0 %v338_v52  ;;  %377 = vmatpush1.bf16.msra.mxu1 %v338_v52  ;;  %v190_v52 = vld [vmem:[%s677_s2 + $0xa8] sm:$0xff] }
  0x1c   :  { %340 = vmatprep.subr.bf16.mxu0 %v397_v3  ;;  %366 = vmatprep.subr.bf16.mxu1 %v397_v3  ;;  %v356_v53 = vpack.c.bf16 %v190_v52, %v189_v51 }
  0x1f   :  { %342 = vmatpush1.bf16.msra.mxu0 %v341_v16  ;;  %378 = vmatpush1.bf16.msra.mxu1 %v341_v16 }
  0x20   :  { %343 = vmatprep.subr.bf16.mxu0 %v397_v3  ;;  %367 = vmatprep.subr.bf16.mxu1 %v397_v3 }
  0x23   :  { %345 = vmatpush1.bf16.msra.mxu0 %v344_v41  ;;  %379 = vmatpush1.bf16.msra.mxu1 %v344_v41 }
  0x24   :  { %346 = vmatprep.subr.bf16.mxu0 %v397_v3  ;;  %368 = vmatprep.subr.bf16.mxu1 %v397_v3 }
  0x27   :  { %348 = vmatpush1.bf16.msra.mxu0 %v347_v44  ;;  %380 = vmatpush1.bf16.msra.mxu1 %v347_v44 }
  0x28   :  { %349 = vmatprep.subr.bf16.mxu0 %v397_v3  ;;  %369 = vmatprep.subr.bf16.mxu1 %v397_v3 }
  0x2b   :  { %351 = vmatpush1.bf16.msra.mxu0 %v350_v47  ;;  %381 = vmatpush1.bf16.msra.mxu1 %v350_v47 }
  0x2c   :  { %352 = vmatprep.subr.bf16.mxu0 %v397_v3  ;;  %370 = vmatprep.subr.bf16.mxu1 %v397_v3 }
  0x2f   :  { %354 = vmatpush1.bf16.msra.mxu0 %v353_v50  ;;  %382 = vmatpush1.bf16.msra.mxu1 %v353_v50 }
  0x30   :  { %355 = vmatprep.subr.bf16.mxu0 %v397_v3  ;;  %371 = vmatprep.subr.bf16.mxu1 %v397_v3 }
  0x33   :  { %357 = vmatpush1.bf16.msra.mxu0 %v356_v53  ;;  %383 = vmatpush1.bf16.msra.mxu1 %v356_v53 }
  0x34   :  { %358 = vmatprep.subr.bf16.mxu0 %v397_v3  ;;  %372 = vmatprep.subr.bf16.mxu1 %v397_v3 }
  0x37   :  { %360 = vmatpush1.bf16.msra.mxu0 %v359_v56  ;;  %384 = vmatpush1.bf16.msra.mxu1 %v359_v56 }
  0x7f   :  { %v389_v57 = vpop.permute.xlu0 %388 }
  0x80   :  { %v391_v58 = vunpack.i.h.bf16 %v389_v57  ;;  %v390_v59 = vunpack.i.l.bf16 %v389_v57 }
  0x82   :  { %v165_v60 = vsel %vm164_vm0, %v575_v11, %v390_v59  ;;  %v167_v61 = vsel %vm164_vm0, %v588_v29, %v391_v58 }
  0x83   :  { %v394_v62 = vpop.permute.xlu0 %393  ;;  %277 = vmatmul.mubr.f32.vlgmr.msra.gmra.mrb[0].mxu0 %v165_v60  ;;  %287 = vmatmul.mubr.f32.vlgmr.msra.gmra.mrb[0].mxu1 %v167_v61 }
  0x84   :  { %v396_v63 = vunpack.i.h.bf16 %v394_v62  ;;  %v395_v2 = vunpack.i.l.bf16 %v394_v62  ;;  %322 = vmatprep.mubr.msk.f32.mxu0 %vm164_vm0, %v594_v32  ;;  %324 = vmatprep.mubr.msk.f32.mxu1 %vm164_vm0, %v147_v39 }
  0x86   :  { %v166_v3 = vsel %vm164_vm0, %v119_v24, %v395_v2  ;;  %v168_v4 = vsel %vm164_vm0, %v121_v25, %v396_v63 }
  0x87   :  { %282 = vmatmul.mubr.f32.gmra.mrb[2].mxu0 %v166_v3  ;;  %292 = vmatmul.mubr.f32.gmra.mrb[2].mxu1 %v168_v4 }
 0x156   :  { %v278_v8 = vpop.f32.mrb[0].mxu0  ;;  %v288_v9 = vpop.f32.mrb[0].mxu1 }
 0x157   :  { %v279_v10 = vadd.f32 %v320_v5, %v278_v8  ;;  %v289_v13 = vadd.f32 %v320_v5, %v288_v9  ;;  %v280_v14 = vpop.f32.mrb[1].mxu0  ;;  %v290_v15 = vpop.f32.mrb[1].mxu1 }
 0x159   :  { %297 = vst [vmem:[%s679_s4] sm:$0xff] %v279_v10  ;;  %299 = vst [vmem:[%s679_s4 + $0x10] sm:$0xff] %v289_v13 }
 0x15a   :  { %v283_v19 = vpop.f32.mrb[2].mxu0  ;;  %v293_v0 = vpop.f32.mrb[2].mxu1 }
 0x15b   :  { %v284_v6 = vadd.f32 %v320_v5, %v283_v19  ;;  %v294_v20 = vadd.f32 %v320_v5, %v293_v0  ;;  %v285_v21 = vpop.f32.mrb[3].mxu0  ;;  %v295_v11 = vpop.f32.mrb[3].mxu1 }
 0x15d   :  { %298 = vst [vmem:[%s679_s4 + $0x8] sm:$0xff] %v284_v6  ;;  %300 = vst [vmem:[%s679_s4 + $0x18] sm:$0xff] %v294_v20 }

</bundles_post_ra>
